<compile_context>
chip_gen: v6e
topology: v6e:2x2x1
jax: 0.10.0
libtpu: 0.0.40
codegen_flags: <defaults>
</compile_context>

<pallas_src>
import functools

import jax
import jax.numpy as jnp
from jax.experimental import pallas as pl
from jax.experimental.pallas import tpu as pltpu

_TARGET_BLOCK_BYTES = 2 * 1024 * 1024   # ~2 MiB input blocks (~85% HBM-roofline class)
_MAX_LANE_BLOCK = 8192                  # bounds the in-kernel chunk unroll to 64 adds
_VMEM_LIMIT_BYTES = 32 * 1024 * 1024    # explicit scoped-VMEM limit, v7x-safe


def _round_up(a, m):
    return (a + m - 1) // m * m


def _pool_plan(R, L, itemsize):
    """Choose (regime, row_block, lane_block) for a (R, L) row-wise reduction."""
    row_mult = 8 * max(1, 4 // itemsize)          # f32: 8, bf16: 16, int8: 32
    if row_mult * L * itemsize <= _TARGET_BLOCK_BYTES:
        # Regime A: a single lane block covers the whole reduction axis.
        rb = (_TARGET_BLOCK_BYTES // (L * itemsize)) // row_mult * row_mult
        rb = max(row_mult, min(rb, _round_up(R, row_mult)))
        return "A", rb, L
    # Regime B: grid the reduction axis and accumulate in VMEM scratch.
    lane_block = _MAX_LANE_BLOCK                  # multiple of 128
    rb = (_TARGET_BLOCK_BYTES // (lane_block * itemsize)) // row_mult * row_mult
    rb = max(row_mult, min(rb, _round_up(R, row_mult)))
    return "B", rb, lane_block


# ---------------------------------------------------------------------------
# Regime A: the whole reduction axis fits one VMEM block per row slab.
# ---------------------------------------------------------------------------
def _pool_kernel(x_ref, o_ref, *, scale):
    # x_ref: (rb, L); o_ref: (rb, 1)
    s = jnp.sum(x_ref[...].astype(jnp.float32), axis=-1, keepdims=True)
    o_ref[...] = (s * scale).astype(o_ref.dtype)


# ---------------------------------------------------------------------------
# Regime B: gridded reduction axis with a lane-dense VMEM accumulator.
# ---------------------------------------------------------------------------
def _pool_acc_kernel(x_ref, o_ref, acc_ref, *, scale, total_l, lane_block,
                     needs_mask):
    # x_ref: (rb, lane_block) slice of the reduction axis
    # o_ref: (rb, 1)   (same output block for every lane step -> stays resident)
    # acc_ref: (rb, 128) f32 VMEM scratch accumulator
    li = pl.program_id(1)

    @pl.when(li == 0)
    def _init():
        acc_ref[...] = jnp.zeros_like(acc_ref)

    # Pure-VPU streaming reduction: add 128-lane chunks into a 128-lane partial
    # sum.  No cross-lane (XLU) work and no width-1 stores in the hot loop.
    part = jnp.zeros(acc_ref.shape, jnp.float32)
    for j in range(lane_block // 128):
        chunk = x_ref[:, j * 128:(j + 1) * 128].astype(jnp.float32)
        if needs_mask:  # ragged final lane block: zero out columns past H*W
            col = (jax.lax.broadcasted_iota(jnp.int32, chunk.shape, 1)
                   + li * lane_block + j * 128)
            chunk = jnp.where(col < total_l, chunk, 0.0)
        part = part + chunk
    acc_ref[...] += part

    # Cross-lane reduce + masked width-1 store exactly once per row block.
    @pl.when(li == pl.num_programs(1) - 1)
    def _finalize():
        s = jnp.sum(acc_ref[...], axis=-1, keepdims=True)
        o_ref[...] = (s * scale).astype(o_ref.dtype)


# ---------------------------------------------------------------------------
# Public wrapper: matches GlobalPool2d.forward.
# ---------------------------------------------------------------------------
def global_pool_2d(x_nchw, pool_type="sum"):
    """x: (B, C, H, W) -> (B, C, 1, 1), torch.sum / torch.mean over dims (2, 3)."""
    B, C, H, W = x_nchw.shape
    if pool_type == "sum":
        scale = 1.0
    elif pool_type == "avg":
        scale = 1.0 / (H * W)
    else:
        raise ValueError(f"Invalid pooling type {pool_type} !")

    R, L = B * C, H * W
    xf = x_nchw.reshape(R, L)                 # free: NCHW is already row-major (R, L)
    itemsize = jnp.dtype(x_nchw.dtype).itemsize
    regime, rb, lane_block = _pool_plan(R, L, itemsize)

    if regime == "A":
        out = pl.pallas_call(
            functools.partial(_pool_kernel, scale=scale),
            out_shape=jax.ShapeDtypeStruct((R, 1), x_nchw.dtype),
            grid=(pl.cdiv(R, rb),),
            in_specs=[pl.BlockSpec((rb, L), lambda i: (i, 0))],
            out_specs=pl.BlockSpec((rb, 1), lambda i: (i, 0)),
            compiler_params=pltpu.CompilerParams(
                dimension_semantics=("parallel",),
                vmem_limit_bytes=_VMEM_LIMIT_BYTES),
        )(xf)
    else:
        out = pl.pallas_call(
            functools.partial(_pool_acc_kernel, scale=scale, total_l=L,
                              lane_block=lane_block,
                              needs_mask=(L % lane_block != 0)),
            out_shape=jax.ShapeDtypeStruct((R, 1), x_nchw.dtype),
            grid=(pl.cdiv(R, rb), pl.cdiv(L, lane_block)),
            in_specs=[pl.BlockSpec((rb, lane_block), lambda i, j: (i, j))],
            out_specs=pl.BlockSpec((rb, 1), lambda i, j: (i, 0)),
            scratch_shapes=[pltpu.VMEM((rb, 128), jnp.float32)],
            compiler_params=pltpu.CompilerParams(
                dimension_semantics=("parallel", "arbitrary"),
                vmem_limit_bytes=_VMEM_LIMIT_BYTES),
        )(xf)

    return out.reshape(B, C, 1, 1)


if __name__ == "__main__":
    key = jax.random.PRNGKey(0)
    k1, k2, k3, k4 = jax.random.split(key, 4)

    # Case 1: spec-sized input (B=2, C=4, 16x16) -> regime A, sum & avg.
    x1 = jax.random.normal(k1, (2, 4, 16, 16), jnp.float32)
    s1 = global_pool_2d(x1, "sum")
    a1 = global_pool_2d(x1, "avg")
    jax.block_until_ready(s1)
    jax.block_until_ready(a1)
    assert s1.shape == (2, 4, 1, 1) and a1.shape == (2, 4, 1, 1)
    assert jnp.allclose(s1, jnp.sum(x1, axis=(2, 3), keepdims=True),
                        rtol=1e-5, atol=1e-3)
    assert jnp.allclose(a1, jnp.mean(x1, axis=(2, 3), keepdims=True),
                        rtol=1e-5, atol=1e-5)

    # Case 2: spatial extent not a multiple of 128 (regime A, ragged lanes).
    x2 = jax.random.normal(k2, (2, 4, 10, 10), jnp.float32)
    s2 = global_pool_2d(x2, "sum")
    jax.block_until_ready(s2)
    assert jnp.allclose(s2, jnp.sum(x2, axis=(2, 3), keepdims=True),
                        rtol=1e-5, atol=1e-3)

    # Case 3: large spatial map -> regime B (gridded "arbitrary" reduction axis,
    # VMEM accumulator, ragged final lane block handled by masking).
    x3 = jax.random.normal(k3, (1, 8, 280, 250), jnp.float32)   # H*W = 70000
    s3 = global_pool_2d(x3, "sum")
    a3 = global_pool_2d(x3, "avg")
    jax.block_until_ready(s3)
    jax.block_until_ready(a3)
    assert s3.shape == (1, 8, 1, 1)
    assert jnp.allclose(s3, jnp.sum(x3, axis=(2, 3), keepdims=True),
                        rtol=1e-3, atol=1e-1)
    assert jnp.allclose(a3, jnp.mean(x3, axis=(2, 3), keepdims=True),
                        rtol=1e-3, atol=1e-5)

    # Case 4: bf16 input (dtype preserved, f32 accumulation inside the kernel).
    x4 = jax.random.normal(k4, (2, 16, 16, 16), jnp.float32).astype(jnp.bfloat16)
    s4 = global_pool_2d(x4, "sum")
    jax.block_until_ready(s4)
    assert s4.dtype == jnp.bfloat16 and s4.shape == (2, 16, 1, 1)
    ref4 = jnp.sum(x4.astype(jnp.float32), axis=(2, 3), keepdims=True)
    assert jnp.allclose(s4.astype(jnp.float32), ref4, rtol=2e-2, atol=3e-1)

    print("KERNEL_OK")
</pallas_src>

<mosaic_0001>
module attributes {stable_mosaic.version = 11 : i64} {
  func.func @_pool_kernel(%arg0: i32, %arg1: memref<8x256xf32, #tpu.memory_space<vmem>>, %arg2: memref<8x1xf32, #tpu.memory_space<vmem>>) attributes {dimension_semantics = [#tpu.dimension_semantics<parallel>], iteration_bounds = array<i64: 1>, scalar_prefetch = 0 : i64, scratch_operands = 0 : i64, tpu.core_type = #tpu.core_type<tc>, window_params = [{transform_indices = @transform_0, window_bounds = array<i64: 8, 256>}, {transform_indices = @transform_1, window_bounds = array<i64: 8, 1>}]} {
    %c0 = arith.constant 0 : index
    %c0_0 = arith.constant 0 : index
    %0 = vector.load %arg1[%c0, %c0_0] : memref<8x256xf32, #tpu.memory_space<vmem>>, vector<8x256xf32>
    %cst = arith.constant dense<0.000000e+00> : vector<8xf32>
    %1 = vector.multi_reduction <add>, %0, %cst [1] : vector<8x256xf32> to vector<8xf32>
    %2 = vector.shape_cast %1 : vector<8xf32> to vector<8x1xf32>
    %cst_1 = arith.constant 1.000000e+00 : f32
    %3 = vector.broadcast %cst_1 : f32 to vector<8x1xf32>
    %4 = arith.mulf %2, %3 : vector<8x1xf32>
    %c0_2 = arith.constant 0 : index
    %c0_3 = arith.constant 0 : index
    %5 = vector.load %arg2[%c0_2, %c0_3] : memref<8x1xf32, #tpu.memory_space<vmem>>, vector<8x1xf32>
    tpu.vector_store %arg2[%c0_2, %c0_3], %4 {strides = array<i32>} : memref<8x1xf32, #tpu.memory_space<vmem>>, vector<8x1xf32>,
    return
  }
  func.func @transform_0(%arg0: i32) -> (i32, i32) {
    %c0_i32 = arith.constant 0 : i32
    %c0_i32_0 = arith.constant 0 : i32
    return %arg0, %c0_i32 : i32, i32
  }
  func.func @transform_1(%arg0: i32) -> (i32, i32) {
    %c0_i32 = arith.constant 0 : i32
    %c0_i32_0 = arith.constant 0 : i32
    return %arg0, %c0_i32 : i32, i32
  }
}

</mosaic_0001>

<bundles_post_ra>
// kernel: tpu_custom_call.1
= control target key start
LH: loop header
LB: loop body
LE: loop exit
PB: predicated region body
PF: predicated region fallthrough
CT: control target
= control target key end

     0   :  { %6 = vsyncpa [#allocation3], 0  ;;  %s55_s6 = smov [#allocation2]   ;;  %s72_s0 = inlined_call_operand.hbm [shape: f32[8,256], index: 0, kind: input, shape index: {}]   ;;  %s73_s1 = inlined_call_operand.vmem [shape: f32[8,1], index: 1, kind: output, shape index: {}]  }
   0x1   :  { %s13_s7 = sshll.u32 %s55_s6, 4  ;;  %s14_s7 = int_to_ptr.vmem [resolvable:$true] %s13_s7 }
   0x2   :  { %s41_s8 = scalar_lea.vmem %s14_s7, 256  ;;  %p46_p1 = scmp.lt.s32.totalorder %s14_s7, %s14_s7 }
   0x3   :  { %p42_p0 = scmp.ne.s32.totalorder %s14_s7, %s41_s8  ;;  %p47_p2 = scmp.lt.s32.totalorder %s41_s8, %s41_s8 }
   0x5   :  { %p48_p3 = por %p47_p2, %p46_p1 }
   0x7   :  { %p49_p4 = pnand %p48_p3, %p42_p0 }
   0x9   :  { %52 = shalt.err (!%p49_p4)
}
   0xa   :  { %16 = dma.hbm_to_vmem [thread:$0]  %s72_s0, 256, %s14_s7, [#allocation3]  }
   0xb   :  { %53 = dma.done.wait [#allocation3], 256  }
   0xc   :  { %54 = vsyncadd [#allocation3], 4294967040  ;;  %v20_v0 = vld [vmem:[#allocation2] sm:$0xff]  ;;  %v21_v1 = vld [vmem:[#allocation2 + $0x8] sm:$0xff]  ;;  %vm25_vm0 = vcmask 7168  }
   0xd   :  { %v22_v2 = vadd.f32 %v21_v1, %v20_v0 }
   0xf   :  { %23 = vadd.xlane.f32.xlu0 %v22_v2 }
  0x98   :  { %v24_v3 = vpop.xlane.xlu0 %23 }
  0x99   :  { %26 = vst.msk [vmem:[%s73_s1] sm:$0xff] %vm25_vm0, %v24_v3 }
  0x9a   :  { %31 = vsyncpa [#allocation3], 1 }

</bundles_post_ra>
